<compile_context>
chip_gen: v7x
topology: tpu7x:2x2x1
jax: 0.10.0
libtpu: 0.0.40
codegen_flags: <defaults>
</compile_context>

<pallas_src>
import functools

import jax
import jax.numpy as jnp
from jax.experimental import pallas as pl
from jax.experimental.pallas import tpu as pltpu


_LN_EPS = 1e-5  # torch.nn.LayerNorm default


# ---------------------------------------------------------------------------
# Parameter initialization (mirrors nn.init.orthogonal_(gain=sqrt(2)), zero
# biases; LayerNorm starts at gamma=1, beta=0).
# ---------------------------------------------------------------------------
def orthogonal_init(key, out_dim, in_dim, gain):
    a = jax.random.normal(key, (max(out_dim, in_dim), min(out_dim, in_dim)), jnp.float32)
    q, r = jnp.linalg.qr(a)
    q = q * jnp.sign(jnp.diagonal(r))[None, :]
    if out_dim < in_dim:
        q = q.T
    return (gain * q[:out_dim, :in_dim]).astype(jnp.float32)


def init_critic_params(key, state_dim, action_dim, hidden_dims=(32, 32)):
    assert len(hidden_dims) == 2, "kernel below is written for two hidden layers"
    d_in = state_dim + action_dim
    h1, h2 = hidden_dims
    k1, k2, k3 = jax.random.split(key, 3)
    gain = jnp.sqrt(2.0)
    return {
        # raw weights stored (in, out) like the previous version's reference
        "w1": orthogonal_init(k1, h1, d_in, gain).T,
        "b1": jnp.zeros((h1,), jnp.float32),
        "g1": jnp.ones((h1,), jnp.float32),
        "be1": jnp.zeros((h1,), jnp.float32),
        "w2": orthogonal_init(k2, h2, h1, gain).T,
        "b2": jnp.zeros((h2,), jnp.float32),
        "g2": jnp.ones((h2,), jnp.float32),
        "be2": jnp.zeros((h2,), jnp.float32),
        "w3": orthogonal_init(k3, 1, h2, gain).T,   # (h2, 1)
        "b3": jnp.zeros((1,), jnp.float32),
    }


def pack_critic_params(raw, state_dim):
    """One-time host-side repack into the kernel-friendly transposed layout."""
    h1 = raw["w1"].shape[1]
    h2 = raw["w2"].shape[1]
    hmax = max(h1, h2, 1)

    def col(v, n):
        c = jnp.zeros((hmax,), jnp.float32)
        return c.at[:n].set(jnp.asarray(v, jnp.float32).reshape(-1))

    # columns: b1, g1, be1, b2, g2, be2, b3, pad  -> single (hmax, 8) DMA;
    # each column broadcasts over the lane (batch) axis inside the kernel.
    vp = jnp.stack(
        [col(raw["b1"], h1), col(raw["g1"], h1), col(raw["be1"], h1),
         col(raw["b2"], h2), col(raw["g2"], h2), col(raw["be2"], h2),
         col(raw["b3"], 1), jnp.zeros((hmax,), jnp.float32)],
        axis=1,
    )
    return {
        "w1s": raw["w1"][:state_dim].T,     # (h1, state_dim)
        "w1a": raw["w1"][state_dim:].T,     # (h1, action_dim)
        "w2": raw["w2"].T,                  # (h2, h1)
        "w3": raw["w3"].reshape(1, h2),     # (1, h2) lane row
        "vp": vp,                           # (hmax, 8)
    }


# ---------------------------------------------------------------------------
# Kernel
# ---------------------------------------------------------------------------
def _layernorm_t(h, gamma_col, beta_col):
    """LayerNorm over the feature (sublane) axis of an (H, TB) activation.

    Two-pass centered variance (matches torch.nn.LayerNorm, avoids
    E[x^2]-E[x]^2 cancellation).  Both feature reductions are expressed as
    (1,H)@(H,TB) matmuls so they run on the idle MXU rather than the XLU.
    """
    n = h.shape[0]
    ones_row = jnp.ones((1, n), jnp.float32)
    inv_n = 1.0 / n
    mu = jnp.dot(ones_row, h, preferred_element_type=jnp.float32) * inv_n      # (1, TB)
    d = h - mu                                                                  # sublane bcast
    var = jnp.dot(ones_row, d * d, preferred_element_type=jnp.float32) * inv_n  # (1, TB)
    return d * jax.lax.rsqrt(var + _LN_EPS) * gamma_col + beta_col


def critic_kernel(s_ref, a_ref, w1s_ref, w1a_ref, w2_ref, w3_ref, vp_ref,
                  out_ref, *, h1, h2):
    s = s_ref[...]                                                   # (Ds, TB)
    a = a_ref[...]                                                   # (Da, TB)

    # --- layer 1 (concat fused): W1s@s + W1a@a + b1 -> LN -> ReLU
    h = (jnp.dot(w1s_ref[...], s, preferred_element_type=jnp.float32)
         + jnp.dot(w1a_ref[...], a, preferred_element_type=jnp.float32)
         + vp_ref[:h1, 0:1])                                         # (h1, TB)
    h = _layernorm_t(h, vp_ref[:h1, 1:2], vp_ref[:h1, 2:3])
    h = jnp.maximum(h, 0.0)

    # --- hidden block: Linear -> LN -> ReLU
    h = jnp.dot(w2_ref[...], h, preferred_element_type=jnp.float32) + vp_ref[:h2, 3:4]
    h = _layernorm_t(h, vp_ref[:h2, 4:5], vp_ref[:h2, 5:6])
    h = jnp.maximum(h, 0.0)                                          # (h2, TB)

    # --- output layer: lane-dense (1, TB) row via degenerate MXU matmul
    q = jnp.dot(w3_ref[...], h, preferred_element_type=jnp.float32) + vp_ref[0:1, 6:7]
    out_ref[...] = q


# ---------------------------------------------------------------------------
# Wrapper
# ---------------------------------------------------------------------------
def _round_up(x, m):
    return ((x + m - 1) // m) * m


def _choose_batch_tile(B, cap=8192):
    """Pick (batch_tile, padded_batch).

    Small B: one full-array tile (lane dim == full array dim is legal, no pad).
    Large B: lane-dense 128-multiple tiles, capped at `cap` (a (cap, 32) f32
    intermediate is ~1 MiB — comfortable on v5e/v6e/v7x VMEM), and >= 2 grid
    steps so the 'parallel' batch axis shards across both v7x TensorCores.
    """
    if B <= 256:
        return B, B
    tb = min(_round_up((B + 1) // 2, 128), cap)
    return tb, _round_up(B, tb)


@jax.jit
def critic_forward(state, action, packed):
    state = state.astype(jnp.float32)
    action = action.astype(jnp.float32)
    w1s, w1a, w2, w3, vp = (packed["w1s"], packed["w1a"], packed["w2"],
                            packed["w3"], packed["vp"])
    B, ds = state.shape
    da = action.shape[1]
    h1 = w1s.shape[0]
    h2 = w2.shape[0]

    TB, B_pad = _choose_batch_tile(B)
    grid = (B_pad // TB,)

    # Transpose (+ zero-pad the batch axis) on the wrapper side: pure layout
    # plumbing on a (B, 16) f32 array.  Padded columns are zeros -> finite,
    # benign per-column results that are sliced off below.
    s_t = state.T                                                    # (ds, B)
    a_t = action.T                                                   # (da, B)
    if B_pad != B:
        s_t = jnp.pad(s_t, ((0, 0), (0, B_pad - B)))
        a_t = jnp.pad(a_t, ((0, 0), (0, B_pad - B)))

    kernel = functools.partial(critic_kernel, h1=h1, h2=h2)

    q_t = pl.pallas_call(
        kernel,
        out_shape=jax.ShapeDtypeStruct((1, B_pad), jnp.float32),
        grid_spec=pltpu.PrefetchScalarGridSpec(
            num_scalar_prefetch=0,
            grid=grid,
            in_specs=[
                pl.BlockSpec((ds, TB), lambda i: (0, i)),     # state tile
                pl.BlockSpec((da, TB), lambda i: (0, i)),     # action tile
                pl.BlockSpec(w1s.shape, lambda i: (0, 0)),    # weights resident
                pl.BlockSpec(w1a.shape, lambda i: (0, 0)),
                pl.BlockSpec(w2.shape, lambda i: (0, 0)),
                pl.BlockSpec(w3.shape, lambda i: (0, 0)),
                pl.BlockSpec(vp.shape, lambda i: (0, 0)),     # packed vectors
            ],
            out_specs=pl.BlockSpec((1, TB), lambda i: (0, i)),
        ),
        compiler_params=pltpu.CompilerParams(
            dimension_semantics=("parallel",)),
    )(s_t, a_t, w1s, w1a, w2, w3, vp)

    return q_t.reshape(-1, 1)[:B]                                    # (B, 1)


# ---------------------------------------------------------------------------
# Pure-JAX reference for correctness (uses the raw, unpacked params).
# ---------------------------------------------------------------------------
def critic_forward_ref(state, action, raw):
    x = jnp.concatenate([state, action], axis=1).astype(jnp.float32)

    def ln(h, g, b):
        mu = jnp.mean(h, axis=-1, keepdims=True)
        var = jnp.mean((h - mu) ** 2, axis=-1, keepdims=True)
        return (h - mu) / jnp.sqrt(var + _LN_EPS) * g + b

    h = jnp.maximum(ln(x @ raw["w1"] + raw["b1"], raw["g1"], raw["be1"]), 0.0)
    h = jnp.maximum(ln(h @ raw["w2"] + raw["b2"], raw["g2"], raw["be2"]), 0.0)
    return h @ raw["w3"] + raw["b3"]


if __name__ == "__main__":
    key = jax.random.PRNGKey(0)
    k_param, k_state, k_action = jax.random.split(key, 3)

    state_dim, action_dim = 12, 4
    hidden_dims = (32, 32)

    raw = init_critic_params(k_param, state_dim, action_dim, hidden_dims)
    packed = pack_critic_params(raw, state_dim)

    # Case 1: small batch -> single full-array tile, no padding.
    batch = 8
    state = jax.random.normal(k_state, (batch, state_dim), jnp.float32)
    action = jax.random.normal(k_action, (batch, action_dim), jnp.float32)
    q = critic_forward(state, action, packed)
    jax.block_until_ready(q)
    q_ref = critic_forward_ref(state, action, raw)
    assert q.shape == (batch, 1), q.shape
    assert jnp.allclose(q, q_ref, atol=1e-4, rtol=1e-4), (q, q_ref)

    # Case 2: larger batch -> padded lane-dense tiles, >= 2 parallel grid steps.
    batch2 = 384
    state2 = jax.random.normal(k_state, (batch2, state_dim), jnp.float32)
    action2 = jax.random.normal(k_action, (batch2, action_dim), jnp.float32)
    q2 = critic_forward(state2, action2, packed)
    jax.block_until_ready(q2)
    q2_ref = critic_forward_ref(state2, action2, raw)
    assert q2.shape == (batch2, 1), q2.shape
    assert jnp.allclose(q2, q2_ref, atol=1e-4, rtol=1e-4)

    print("KERNEL_OK")
</pallas_src>

<mosaic_0001>
module attributes {stable_mosaic.version = 11 : i64} {
  func.func @critic_kernel(%arg0: i32, %arg1: memref<12x8xf32, #tpu.memory_space<vmem>>, %arg2: memref<4x8xf32, #tpu.memory_space<vmem>>, %arg3: memref<32x12xf32, #tpu.memory_space<vmem>>, %arg4: memref<32x4xf32, #tpu.memory_space<vmem>>, %arg5: memref<32x32xf32, #tpu.memory_space<vmem>>, %arg6: memref<1x32xf32, #tpu.memory_space<vmem>>, %arg7: memref<32x8xf32, #tpu.memory_space<vmem>>, %arg8: memref<1x8xf32, #tpu.memory_space<vmem>>) attributes {dimension_semantics = [#tpu.dimension_semantics<parallel>], iteration_bounds = array<i64: 1>, scalar_prefetch = 0 : i64, scratch_operands = 0 : i64, tpu.core_type = #tpu.core_type<tc>, window_params = [{transform_indices = @transform_0, window_bounds = array<i64: 12, 8>}, {transform_indices = @transform_1, window_bounds = array<i64: 4, 8>}, {pipeline_mode = #tpu.pipeline_mode<synchronous>, transform_indices = @transform_2, window_bounds = array<i64: 32, 12>}, {pipeline_mode = #tpu.pipeline_mode<synchronous>, transform_indices = @transform_3, window_bounds = array<i64: 32, 4>}, {pipeline_mode = #tpu.pipeline_mode<synchronous>, transform_indices = @transform_4, window_bounds = array<i64: 32, 32>}, {pipeline_mode = #tpu.pipeline_mode<synchronous>, transform_indices = @transform_5, window_bounds = array<i64: 1, 32>}, {pipeline_mode = #tpu.pipeline_mode<synchronous>, transform_indices = @transform_6, window_bounds = array<i64: 32, 8>}, {transform_indices = @transform_7, window_bounds = array<i64: 1, 8>}]} {
    %c0 = arith.constant 0 : index
    %c0_0 = arith.constant 0 : index
    %0 = vector.load %arg1[%c0, %c0_0] : memref<12x8xf32, #tpu.memory_space<vmem>>, vector<12x8xf32>
    %c0_1 = arith.constant 0 : index
    %c0_2 = arith.constant 0 : index
    %1 = vector.load %arg2[%c0_1, %c0_2] : memref<4x8xf32, #tpu.memory_space<vmem>>, vector<4x8xf32>
    %c0_3 = arith.constant 0 : index
    %c0_4 = arith.constant 0 : index
    %2 = vector.load %arg3[%c0_3, %c0_4] : memref<32x12xf32, #tpu.memory_space<vmem>>, vector<32x12xf32>
    %cst = arith.constant dense<0.000000e+00> : vector<32x8xf32>
    %3 = tpu.matmul %2, %0, %cst {dimension_numbers = #tpu.dot_dimension_numbers<[1], [0], [0], [1], [0, 0, 1, 1], [], []>} : vector<32x12xf32>, vector<12x8xf32>, vector<32x8xf32> -> vector<32x8xf32>
    %c0_5 = arith.constant 0 : index
    %c0_6 = arith.constant 0 : index
    %4 = vector.load %arg4[%c0_5, %c0_6] : memref<32x4xf32, #tpu.memory_space<vmem>>, vector<32x4xf32>
    %cst_7 = arith.constant dense<0.000000e+00> : vector<32x8xf32>
    %5 = tpu.matmul %4, %1, %cst_7 {dimension_numbers = #tpu.dot_dimension_numbers<[1], [0], [0], [1], [0, 0, 1, 1], [], []>} : vector<32x4xf32>, vector<4x8xf32>, vector<32x8xf32> -> vector<32x8xf32>
    %6 = arith.addf %3, %5 : vector<32x8xf32>
    %c0_8 = arith.constant 0 : index
    %c0_9 = arith.constant 0 : index
    %7 = vector.load %arg7[%c0_8, %c0_9] : memref<32x8xf32, #tpu.memory_space<vmem>>, vector<32x1xf32>
    %8 = vector.broadcast %7 : vector<32x1xf32> to vector<32x8xf32>
    %9 = arith.addf %6, %8 : vector<32x8xf32>
    %c0_10 = arith.constant 0 : index
    %c1 = arith.constant 1 : index
    %10 = vector.load %arg7[%c0_10, %c1] : memref<32x8xf32, #tpu.memory_space<vmem>>, vector<32x1xf32>
    %c0_11 = arith.constant 0 : index
    %c2 = arith.constant 2 : index
    %11 = vector.load %arg7[%c0_11, %c2] : memref<32x8xf32, #tpu.memory_space<vmem>>, vector<32x1xf32>
    %cst_12 = arith.constant 1.000000e+00 : f32
    %12 = vector.broadcast %cst_12 : f32 to vector<1x32xf32>
    %cst_13 = arith.constant dense<0.000000e+00> : vector<1x8xf32>
    %13 = tpu.matmul %12, %9, %cst_13 {dimension_numbers = #tpu.dot_dimension_numbers<[1], [0], [0], [1], [0, 0, 1, 1], [], []>} : vector<1x32xf32>, vector<32x8xf32>, vector<1x8xf32> -> vector<1x8xf32>
    %cst_14 = arith.constant 3.125000e-02 : f32
    %14 = vector.broadcast %cst_14 : f32 to vector<1x8xf32>
    %15 = arith.mulf %13, %14 : vector<1x8xf32>
    %16 = vector.broadcast %15 : vector<1x8xf32> to vector<32x8xf32>
    %17 = arith.subf %9, %16 : vector<32x8xf32>
    %18 = arith.mulf %17, %17 : vector<32x8xf32>
    %cst_15 = arith.constant dense<0.000000e+00> : vector<1x8xf32>
    %19 = tpu.matmul %12, %18, %cst_15 {dimension_numbers = #tpu.dot_dimension_numbers<[1], [0], [0], [1], [0, 0, 1, 1], [], []>} : vector<1x32xf32>, vector<32x8xf32>, vector<1x8xf32> -> vector<1x8xf32>
    %cst_16 = arith.constant 3.125000e-02 : f32
    %20 = vector.broadcast %cst_16 : f32 to vector<1x8xf32>
    %21 = arith.mulf %19, %20 : vector<1x8xf32>
    %cst_17 = arith.constant 9.99999974E-6 : f32
    %22 = vector.broadcast %cst_17 : f32 to vector<1x8xf32>
    %23 = arith.addf %21, %22 : vector<1x8xf32>
    %24 = math.rsqrt %23 : vector<1x8xf32>
    %25 = vector.broadcast %24 : vector<1x8xf32> to vector<32x8xf32>
    %26 = arith.mulf %17, %25 : vector<32x8xf32>
    %27 = vector.broadcast %10 : vector<32x1xf32> to vector<32x8xf32>
    %28 = arith.mulf %26, %27 : vector<32x8xf32>
    %29 = vector.broadcast %11 : vector<32x1xf32> to vector<32x8xf32>
    %30 = arith.addf %28, %29 : vector<32x8xf32>
    %cst_18 = arith.constant 0.000000e+00 : f32
    %31 = vector.broadcast %cst_18 : f32 to vector<32x8xf32>
    %32 = arith.maximumf %30, %31 : vector<32x8xf32>
    %c0_19 = arith.constant 0 : index
    %c0_20 = arith.constant 0 : index
    %33 = vector.load %arg5[%c0_19, %c0_20] : memref<32x32xf32, #tpu.memory_space<vmem>>, vector<32x32xf32>
    %cst_21 = arith.constant dense<0.000000e+00> : vector<32x8xf32>
    %34 = tpu.matmul %33, %32, %cst_21 {dimension_numbers = #tpu.dot_dimension_numbers<[1], [0], [0], [1], [0, 0, 1, 1], [], []>} : vector<32x32xf32>, vector<32x8xf32>, vector<32x8xf32> -> vector<32x8xf32>
    %c0_22 = arith.constant 0 : index
    %c3 = arith.constant 3 : index
    %35 = vector.load %arg7[%c0_22, %c3] : memref<32x8xf32, #tpu.memory_space<vmem>>, vector<32x1xf32>
    %36 = vector.broadcast %35 : vector<32x1xf32> to vector<32x8xf32>
    %37 = arith.addf %34, %36 : vector<32x8xf32>
    %c0_23 = arith.constant 0 : index
    %c4 = arith.constant 4 : index
    %38 = vector.load %arg7[%c0_23, %c4] : memref<32x8xf32, #tpu.memory_space<vmem>>, vector<32x1xf32>
    %c0_24 = arith.constant 0 : index
    %c5 = arith.constant 5 : index
    %39 = vector.load %arg7[%c0_24, %c5] : memref<32x8xf32, #tpu.memory_space<vmem>>, vector<32x1xf32>
    %cst_25 = arith.constant 1.000000e+00 : f32
    %40 = vector.broadcast %cst_25 : f32 to vector<1x32xf32>
    %cst_26 = arith.constant dense<0.000000e+00> : vector<1x8xf32>
    %41 = tpu.matmul %40, %37, %cst_26 {dimension_numbers = #tpu.dot_dimension_numbers<[1], [0], [0], [1], [0, 0, 1, 1], [], []>} : vector<1x32xf32>, vector<32x8xf32>, vector<1x8xf32> -> vector<1x8xf32>
    %cst_27 = arith.constant 3.125000e-02 : f32
    %42 = vector.broadcast %cst_27 : f32 to vector<1x8xf32>
    %43 = arith.mulf %41, %42 : vector<1x8xf32>
    %44 = vector.broadcast %43 : vector<1x8xf32> to vector<32x8xf32>
    %45 = arith.subf %37, %44 : vector<32x8xf32>
    %46 = arith.mulf %45, %45 : vector<32x8xf32>
    %cst_28 = arith.constant dense<0.000000e+00> : vector<1x8xf32>
    %47 = tpu.matmul %40, %46, %cst_28 {dimension_numbers = #tpu.dot_dimension_numbers<[1], [0], [0], [1], [0, 0, 1, 1], [], []>} : vector<1x32xf32>, vector<32x8xf32>, vector<1x8xf32> -> vector<1x8xf32>
    %cst_29 = arith.constant 3.125000e-02 : f32
    %48 = vector.broadcast %cst_29 : f32 to vector<1x8xf32>
    %49 = arith.mulf %47, %48 : vector<1x8xf32>
    %cst_30 = arith.constant 9.99999974E-6 : f32
    %50 = vector.broadcast %cst_30 : f32 to vector<1x8xf32>
    %51 = arith.addf %49, %50 : vector<1x8xf32>
    %52 = math.rsqrt %51 : vector<1x8xf32>
    %53 = vector.broadcast %52 : vector<1x8xf32> to vector<32x8xf32>
    %54 = arith.mulf %45, %53 : vector<32x8xf32>
    %55 = vector.broadcast %38 : vector<32x1xf32> to vector<32x8xf32>
    %56 = arith.mulf %54, %55 : vector<32x8xf32>
    %57 = vector.broadcast %39 : vector<32x1xf32> to vector<32x8xf32>
    %58 = arith.addf %56, %57 : vector<32x8xf32>
    %cst_31 = arith.constant 0.000000e+00 : f32
    %59 = vector.broadcast %cst_31 : f32 to vector<32x8xf32>
    %60 = arith.maximumf %58, %59 : vector<32x8xf32>
    %c0_32 = arith.constant 0 : index
    %c0_33 = arith.constant 0 : index
    %61 = vector.load %arg6[%c0_32, %c0_33] : memref<1x32xf32, #tpu.memory_space<vmem>>, vector<1x32xf32>
    %cst_34 = arith.constant dense<0.000000e+00> : vector<1x8xf32>
    %62 = tpu.matmul %61, %60, %cst_34 {dimension_numbers = #tpu.dot_dimension_numbers<[1], [0], [0], [1], [0, 0, 1, 1], [], []>} : vector<1x32xf32>, vector<32x8xf32>, vector<1x8xf32> -> vector<1x8xf32>
    %c0_35 = arith.constant 0 : index
    %c6 = arith.constant 6 : index
    %63 = vector.load %arg7[%c0_35, %c6] : memref<32x8xf32, #tpu.memory_space<vmem>>, vector<1x1xf32>
    %64 = vector.broadcast %63 : vector<1x1xf32> to vector<1x8xf32>
    %65 = arith.addf %62, %64 : vector<1x8xf32>
    %c0_36 = arith.constant 0 : index
    %c0_37 = arith.constant 0 : index
    %66 = vector.load %arg8[%c0_36, %c0_37] : memref<1x8xf32, #tpu.memory_space<vmem>>, vector<1x8xf32>
    tpu.vector_store %arg8[%c0_36, %c0_37], %65 {strides = array<i32>} : memref<1x8xf32, #tpu.memory_space<vmem>>, vector<1x8xf32>,
    return
  }
  func.func @transform_0(%arg0: i32) -> (i32, i32) {
    %c0_i32 = arith.constant 0 : i32
    %c0_i32_0 = arith.constant 0 : i32
    return %c0_i32, %arg0 : i32, i32
  }
  func.func @transform_1(%arg0: i32) -> (i32, i32) {
    %c0_i32 = arith.constant 0 : i32
    %c0_i32_0 = arith.constant 0 : i32
    return %c0_i32, %arg0 : i32, i32
  }
  func.func @transform_2(%arg0: i32) -> (i32, i32) {
    %c0_i32 = arith.constant 0 : i32
    %c0_i32_0 = arith.constant 0 : i32
    %c0_i32_1 = arith.constant 0 : i32
    return %c0_i32, %c0_i32_0 : i32, i32
  }
  func.func @transform_3(%arg0: i32) -> (i32, i32) {
    %c0_i32 = arith.constant 0 : i32
    %c0_i32_0 = arith.constant 0 : i32
    %c0_i32_1 = arith.constant 0 : i32
    return %c0_i32, %c0_i32_0 : i32, i32
  }
  func.func @transform_4(%arg0: i32) -> (i32, i32) {
    %c0_i32 = arith.constant 0 : i32
    %c0_i32_0 = arith.constant 0 : i32
    %c0_i32_1 = arith.constant 0 : i32
    return %c0_i32, %c0_i32_0 : i32, i32
  }
  func.func @transform_5(%arg0: i32) -> (i32, i32) {
    %c0_i32 = arith.constant 0 : i32
    %c0_i32_0 = arith.constant 0 : i32
    %c0_i32_1 = arith.constant 0 : i32
    return %c0_i32, %c0_i32_0 : i32, i32
  }
  func.func @transform_6(%arg0: i32) -> (i32, i32) {
    %c0_i32 = arith.constant 0 : i32
    %c0_i32_0 = arith.constant 0 : i32
    %c0_i32_1 = arith.constant 0 : i32
    return %c0_i32, %c0_i32_0 : i32, i32
  }
  func.func @transform_7(%arg0: i32) -> (i32, i32) {
    %c0_i32 = arith.constant 0 : i32
    %c0_i32_0 = arith.constant 0 : i32
    return %c0_i32, %arg0 : i32, i32
  }
}

</mosaic_0001>

<bundles_post_ra>
// kernel: critic_forward.1
= control target key start
LH: loop header
LB: loop body
LE: loop exit
PB: predicated region body
PF: predicated region fallthrough
CT: control target
= control target key end

     0   :  { %vm51_vm0 = vcmask 1043456   ;;  %vm38_vm1 = vcmask 31744   ;;  %vm1159_vm2 = vmmov 1   ;;  %v1160_v7 = vmov 0   ;;  %s1366_s0 = inlined_call_operand.vmem [shape: f32[12,8], index: 0, kind: input, shape index: {}]   ;;  %s1367_s1 = inlined_call_operand.vmem [shape: f32[4,8], index: 1, kind: input, shape index: {}]   ;;  %s1368_s2 = inlined_call_operand.vmem [shape: f32[32,12], index: 2, kind: input, shape index: {}]   ;;  %s1369_s3 = inlined_call_operand.vmem [shape: f32[32,4], index: 3, kind: input, shape index: {}]   ;;  %s1370_s4 = inlined_call_operand.vmem [shape: f32[32,32], index: 4, kind: input, shape index: {}]   ;;  %s1371_s5 = inlined_call_operand.vmem [shape: f32[1,32], index: 5, kind: input, shape index: {}]   ;;  %s1372_s6 = inlined_call_operand.vmem [shape: f32[32,8], index: 6, kind: input, shape index: {}]   ;;  %s1373_s7 = inlined_call_operand.hbm [shape: f32[1,8], index: 7, kind: output, shape index: {}]  }
   0x1   :  { %v29_v0 = vld [vmem:[%s1367_s1] sm:$0xf]  ;;  %v35_v2 = vld [vmem:[%s1369_s3 + $0x8] sm:$0xff]  ;;  %v36_v5 = vld [vmem:[%s1369_s3 + $0x10] sm:$0xff]  ;;  %1113 = vset.pattern.permute.xlu0 %v1160_v7  ;;  %vm140_vm4 = vcmask 97280  }
   0x2   :  { %v34_v1 = vld [vmem:[%s1369_s3] sm:$0xff]  ;;  %965 = vmatprep.subr.msk.mxu0 %vm51_vm0, %v29_v0  ;;  %v28_v4 = vld [vmem:[%s1366_s0 + $0x8] sm:$0xf]  ;;  %vm1053_vm3 = vmpackc.low %vm51_vm0, %vm1159_vm2 }
   0x3   :  { %967 = vmatprep.mubr.msk.f32.mxu0 %vm38_vm1, %v34_v1  ;;  %v27_v3 = vld [vmem:[%s1366_s0] sm:$0xff]  ;;  %966 = vmatpush3.msk.msra.mxu0 %vm51_vm0, %v29_v0  ;;  %v37_v8 = vld [vmem:[%s1369_s3 + $0x18] sm:$0xff]  ;;  %v1244_v10 = vld [vmem:[%s1372_s6 + $0x10] sm:$0xff] }
   0x4   :  { %v1052_v6 = vpack.c.bf16 %v28_v4, %v27_v3  ;;  %968 = vmatmul.mubr.msk.f32.vlgmr.msra.gmra.mrb[0].mxu0 %vm38_vm1, %v35_v2  ;;  %v1239_v9 = vld [vmem:[%s1372_s6] sm:$0xff] }
   0x5   :  { %970 = vmatprep.mubr.msk.f32.mxu0 %vm38_vm1, %v36_v5  ;;  %v30_v11 = vld [vmem:[%s1368_s2] sm:$0xff]  ;;  %247 = vperm.xlu0 %1113, %v1239_v9  }
   0x6   :  { %1054 = vmatprep.subr.msk.bf16.mxu0 %vm1053_vm3, %v1052_v6 }
   0x7   :  { %1057 = vmatpush3.bf16.msk.msra.mxu0 %vm1053_vm3, %v1052_v6 }
   0x8   :  { %12 = vsyncpa [#allocation3], 0  ;;  %1114 = vset.pattern.permute.xlu1 %v1160_v7  ;;  %v1253_v12 = vld [vmem:[%s1372_s6 + $0x8] sm:$0xff]  ;;  %971 = vmatmul.mubr.msk.f32.gmra.mrb[2].mxu0 %vm38_vm1, %v37_v8  ;;  %v1264_v14 = vld [vmem:[%s1372_s6 + $0x18] sm:$0xff]  ;;  %v1161_v17 = vmov 0.0|0.0   ;;  %vm1162_vm5 = vmmov 0   ;;  %v344_v36 = vlaneseq }
   0x9   :  { %257 = vperm.xlu1 %1114, %v1244_v10   ;;  %977 = vmatprep.mubr.msk.f32.mxu0 %vm140_vm4, %v30_v11  ;;  %v31_v13 = vld [vmem:[%s1368_s2 + $0x8] sm:$0xff]  ;;  %v32_v15 = vld [vmem:[%s1368_s2 + $0x10] sm:$0xff]  ;;  %v33_v16 = vld [vmem:[%s1368_s2 + $0x18] sm:$0xff]  ;;  %v1163_v18 = vmov 0.0   ;;  %vm269_vm6 = vcmask 261120   ;;  %v1164_v33 = vmov 1.0  }
   0xa   :  { %252 = vperm.xlu0 %1113, %v1253_v12   ;;  %1058 = vmatprep.subr.bf16.mxu1 %v1161_v17  ;;  %v1165_v34 = vmov 1   ;;  %v1166_v35 = vmov 2   ;;  %v345_v37 = vshrl.u32 %v344_v36, 7  ;;  %v481_v53 = vld [vmem:[%s1370_s4] sm:$0xff]  ;;  %v1167_v54 = vmov 3   ;;  %s1171_s13 = smov [#allocation2]  }
   0xb   :  { %991 = vmatprep.mubr.msk.f32.mxu1 %vm1162_vm5, %v1163_v18  ;;  %s894_s0 = sshll.u32 %s1171_s13, 4  ;;  %vm886_vm7 = vcmask 57344   ;;  %s895_s0 = int_to_ptr.vmem [resolvable:$true] %s894_s0 }
   0xc   :  { %978 = vmatmul.mubr.msk.f32.vlgmr.msra.gmra.mrb[0].mxu0 %vm140_vm4, %v31_v13  ;;  %v1294_v38 = vsub.s32 0, %v345_v37  ;;  %s1135_s14 = scalar_lea.vmem %s895_s0, 16  ;;  %s1139_s15 = scalar_lea.vmem %s895_s0, 32 }
   0xd   :  { %262 = vperm.xlu1 %1114, %v1264_v14   ;;  %980 = vmatprep.mubr.msk.f32.mxu0 %vm140_vm4, %v32_v15  ;;  %p1136_p0 = scmp.ne.s32.totalorder %s895_s0, %s1135_s14  ;;  %p1140_p1 = scmp.lt.s32.totalorder %s895_s0, %s895_s0 }
   0xe   :  { %1115 = vset.pattern.permute.xlu0 %v1165_v34  ;;  %p1141_p2 = scmp.lt.s32.totalorder %s1139_s15, %s1135_s14 }
   0xf   :  { %438 = vperm.xlu0 %1115, %v1239_v9  }
  0x10   :  { %981 = vmatmul.mubr.msk.f32.gmra.mrb[2].mxu0 %vm140_vm4, %v33_v16  ;;  %p1142_p3 = por %p1141_p2, %p1140_p1 }
  0x11   :  { %1116 = vset.pattern.permute.xlu1 %v1165_v34  ;;  %1013 = vmatprep.mubr.msk.f32.mxu0 %vm269_vm6, %v481_v53 }
  0x12   :  { %442 = vperm.xlu1 %1116, %v1253_v12   ;;  %p1143_p4 = pnand %p1142_p3, %p1136_p0 }
  0x13   :  { %1118 = vset.pattern.permute.xlu0 %v1166_v35 }
  0x14   :  { %462 = vperm.xlu0 %1118, %v1253_v12  }
  0x16   :  { %1117 = vset.pattern.permute.xlu1 %v1166_v35 }
  0x17   :  { %458 = vperm.xlu1 %1117, %v1239_v9  }
  0x18   :  { %466 = vperm.xlu0 %1118, %v1244_v10  }
  0x1b   :  { %1119 = vset.pattern.permute.xlu1 %v1165_v34 }
  0x1c   :  { %446 = vperm.xlu1 %1119, %v1244_v10   ;;  %1121 = vset.pattern.permute.xlu0 %v1167_v54 }
  0x1d   :  { %486 = vperm.xlu0 %1121, %v1239_v9  }
  0x20   :  { %450 = vperm.xlu1 %1119, %v1264_v14  }
  0x21   :  { %498 = vperm.xlu0 %1121, %v1264_v14  }
  0x24   :  { %1120 = vset.pattern.permute.xlu1 %v1166_v35 }
  0x25   :  { %470 = vperm.xlu1 %1120, %v1264_v14  }
  0x29   :  { %1122 = vset.pattern.permute.xlu1 %v1167_v54 }
  0x2a   :  { %490 = vperm.xlu1 %1122, %v1253_v12  }
  0x2e   :  { %494 = vperm.xlu1 %1122, %v1244_v10  }
  0x84   :  { %v248_v19 = vpop.permute.xlu0 %247 }
  0x88   :  { %v258_v20 = vpop.permute.xlu1 %257 }
  0x89   :  { %v253_v21 = vpop.permute.xlu0 %252 }
  0x8c   :  { %v263_v26 = vpop.permute.xlu1 %262 }
  0x8e   :  { %v439_v62 = vpop.permute.xlu0 %438 }
  0x91   :  { %v443_v55 = vpop.permute.xlu1 %442 }
  0x93   :  { %v463_v0 = vpop.permute.xlu0 %462 }
  0x96   :  { %v459_v59 = vpop.permute.xlu1 %458 }
  0x97   :  { %v467_v8 = vpop.permute.xlu0 %466 }
  0x9b   :  { %v447_v61 = vpop.permute.xlu1 %446 }
  0x9f   :  { %v451_v63 = vpop.permute.xlu1 %450 }
  0xa4   :  { %v471_v7 = vpop.permute.xlu1 %470 }
  0xa9   :  { %v491_v34 = vpop.permute.xlu1 %490 }
  0xdf   :  { %v979_v22 = vpop.f32.mrb[0].mxu0 }
  0xe0   :  { %v266_v23 = vadd.f32 %v979_v22, %v253_v21  ;;  %v222_v24 = vpop.f32.mrb[1].mxu0 }
  0xe1   :  { %v265_v25 = vadd.f32 %v248_v19, %v222_v24 }
  0xe3   :  { %v982_v27 = vpop.f32.mrb[2].mxu0  ;;  %v1059_v28 = vpack.c.bf16 %v266_v23, %v265_v25 }
  0xe4   :  { %v268_v29 = vadd.f32 %v982_v27, %v263_v26  ;;  %v232_v30 = vpop.f32.mrb[3].mxu0 }
  0xe5   :  { %v267_v31 = vadd.f32 %v258_v20, %v232_v30  ;;  %1060 = vmatpush3.bf16.msra.mxu1 %v1059_v28  ;;  %v483_v30 = vld [vmem:[%s1370_s4 + $0x10] sm:$0xff] }
  0xe6   :  { %1061 = vmatprep.subr.bf16.mxu1 %v1161_v17 }
  0xe7   :  { %v1062_v32 = vpack.c.bf16 %v268_v29, %v267_v31 }
  0xe9   :  { %1063 = vmatpush3.bf16.msra.mxu1 %v1062_v32  ;;  %v487_v32 = vpop.permute.xlu0 %486 }
  0xea   :  { %1064 = vmatprep.subr.bf16.mxu1 %v1161_v17 }
  0xec   :  { %992 = vmatmul.mubr.msk.f32.vlgmr.msra.gmra.mrb[0].mxu1 %vm269_vm6, %v1164_v33 }
  0xed   :  { %1002 = vmatprep.mubr.msk.f32.mxu1 %vm1162_vm5, %v1163_v18 }
 0x1bf   :  { %v339_v39 = vpop.f32.mrb[0].mxu1 }
 0x1c0   :  { %v343_v40 = vmul.f32 0.03125, %v339_v39  ;;  %v993_v41 = vpop.f32.mrb[1].mxu1 }
 0x1c2   :  { %v347_v42 = vrot.slane %v343_v40, %v1294_v38  ;;  %v499_v40 = vpop.permute.xlu0 %498 }
 0x1c4   :  { %v348_v43 = vsub.f32 %v265_v25, %v347_v42  ;;  %v349_v44 = vsub.f32 %v266_v23, %v347_v42  ;;  %v350_v45 = vsub.f32 %v267_v31, %v347_v42  ;;  %v351_v46 = vsub.f32 %v268_v29, %v347_v42  ;;  %v482_v29 = vld [vmem:[%s1370_s4 + $0x8] sm:$0xff]  ;;  %v484_v31 = vld [vmem:[%s1370_s4 + $0x18] sm:$0xff] }
 0x1c6   :  { %v352_v47 = vmul.f32 %v348_v43, %v348_v43  ;;  %v353_v48 = vmul.f32 %v349_v44, %v349_v44  ;;  %v354_v50 = vmul.f32 %v350_v45, %v350_v45  ;;  %v355_v51 = vmul.f32 %v351_v46, %v351_v46 }
 0x1c8   :  { %v1065_v49 = vpack.c.bf16 %v353_v48, %v352_v47  ;;  %v1068_v52 = vpack.c.bf16 %v355_v51, %v354_v50  ;;  %v1168_v48 = vmov 4  }
 0x1c9   :  { %1123 = vset.pattern.permute.xlu1 %v1168_v48  ;;  %1124 = vset.pattern.permute.xlu0 %v1168_v48 }
 0x1ca   :  { %1066 = vmatpush3.bf16.msra.mxu1 %v1065_v49  ;;  %763 = vperm.xlu1 %1123, %v1239_v9   ;;  %v1169_v49 = vmov 5  }
 0x1cb   :  { %1067 = vmatprep.subr.bf16.mxu1 %v1161_v17  ;;  %767 = vperm.xlu0 %1124, %v1253_v12  }
 0x1ce   :  { %1069 = vmatpush3.bf16.msra.mxu1 %v1068_v52  ;;  %1125 = vset.pattern.permute.xlu1 %v1169_v49 }
 0x1cf   :  { %1078 = vmatprep.subr.bf16.mxu1 %v1161_v17  ;;  %771 = vperm.xlu0 %1124, %v1244_v10  }
 0x1d0   :  { %783 = vperm.xlu1 %1125, %v1239_v9  }
 0x1d1   :  { %1003 = vmatmul.mubr.msk.f32.vlgmr.msra.gmra.mrb[2].mxu1 %vm269_vm6, %v1164_v33 }
 0x1d2   :  { %1027 = vmatprep.mubr.msk.f32.mxu1 %vm1162_vm5, %v1163_v18 }
 0x1d3   :  { %1127 = vset.pattern.permute.xlu0 %v1169_v49 }
 0x1d4   :  { %787 = vperm.xlu1 %1125, %v1253_v12   ;;  %791 = vperm.xlu0 %1127, %v1244_v10  }
 0x1d8   :  { %1126 = vset.pattern.permute.xlu1 %v1168_v48 }
 0x1d9   :  { %775 = vperm.xlu1 %1126, %v1264_v14  }
 0x1dd   :  { %1128 = vset.pattern.permute.xlu1 %v1169_v49 }
 0x1de   :  { %795 = vperm.xlu1 %1128, %v1264_v14   ;;  %v807_v14 = vld [vmem:[%s1372_s6] sm:$0x1] }
 0x2a4   :  { %v422_v56 = vpop.f32.mrb[2].mxu1 }
 0x2a5   :  { %v426_v57 = vmul.f32 0.03125, %v422_v56  ;;  %v1004_v58 = vpop.f32.mrb[3].mxu1 }
 0x2a7   :  { %v427_v60 = vadd.f32 1e-05, %v426_v57 }
 0x2a9   :  { %1131 = vrsqrt.f32 %v427_v60  ;;  %v1170_v60 = vmov 6  }
 0x2aa   :  { %1129 = vset.pattern.permute.xlu1 %v1170_v60  ;;  %1130 = vset.pattern.permute.xlu0 %v1170_v60 }
 0x2ab   :  { %810 = vperm.xlu1 %1129, %v807_v14  }
 0x2b3   :  { %v1132_v1 = vpop.eup %1131 }
 0x2b4   :  { %v432_v2 = vrot.slane %v1132_v1, %v1294_v38 }
 0x2b6   :  { %v434_v3 = vmul.f32 %v432_v2, %v349_v44  ;;  %v435_v4 = vmul.f32 %v432_v2, %v350_v45  ;;  %v433_v5 = vmul.f32 %v432_v2, %v348_v43  ;;  %v436_v6 = vmul.f32 %v432_v2, %v351_v46  ;;  %v495_v43 = vpop.permute.xlu1 %494 }
 0x2b8   :  { %v454_v11 = vmul.f32 %v443_v55, %v434_v3  ;;  %v455_v13 = vmul.f32 %v447_v61, %v435_v4  ;;  %v453_v15 = vmul.f32 %v439_v62, %v433_v5  ;;  %v456_v16 = vmul.f32 %v451_v63, %v436_v6  ;;  %v768_v3 = vpop.permute.xlu0 %767 }
 0x2ba   :  { %v473_v19 = vadd.f32 %v459_v59, %v453_v15  ;;  %v474_v20 = vadd.f32 %v463_v0, %v454_v11  ;;  %v476_v21 = vadd.f32 %v471_v7, %v456_v16  ;;  %v475_v22 = vadd.f32 %v467_v8, %v455_v13  ;;  %v764_v61 = vpop.permute.xlu1 %763 }
 0x2bc   :  { %v477_v23 = vmax.f32 %v473_v19, 0.0  ;;  %v478_v24 = vmax.f32 %v474_v20, 0.0  ;;  %v480_v25 = vmax.f32 %v476_v21, 0.0  ;;  %v479_v26 = vmax.f32 %v475_v22, 0.0  ;;  %v772_v6 = vpop.permute.xlu0 %771 }
 0x2be   :  { %v1070_v27 = vpack.c.bf16 %v478_v24, %v477_v23  ;;  %v1074_v28 = vpack.c.bf16 %v480_v25, %v479_v26  ;;  %v784_v2 = vpop.permute.xlu1 %783 }
 0x2c0   :  { %1071 = vmatprep.subr.bf16.mxu0 %v1070_v27  ;;  %v792_v19 = vpop.permute.xlu0 %791 }
 0x2c1   :  { %1073 = vmatpush3.bf16.msra.mxu0 %v1070_v27 }
 0x2c2   :  { %1075 = vmatprep.subr.bf16.mxu0 %v1074_v28  ;;  %v788_v4 = vpop.permute.xlu1 %787 }
 0x2c5   :  { %1077 = vmatpush3.bf16.msra.mxu0 %v1074_v28 }
 0x2c6   :  { %1084 = vmatprep.subr.bf16.mxu0 %v1161_v17  ;;  %v776_v5 = vpop.permute.xlu1 %775 }
 0x2c8   :  { %1014 = vmatmul.mubr.msk.f32.vlgmr.msra.gmra.mrb[4].mxu0 %vm269_vm6, %v482_v29 }
 0x2c9   :  { %1016 = vmatprep.mubr.msk.f32.mxu0 %vm269_vm6, %v483_v30 }
 0x2ca   :  { %v796_v16 = vpop.permute.xlu1 %795 }
 0x2cc   :  { %1017 = vmatmul.mubr.msk.f32.gmra.mrb[6].mxu0 %vm269_vm6, %v484_v31 }
 0x2cd   :  { %1038 = vmatprep.mubr.msk.f32.mxu0 %vm1162_vm5, %v1163_v18 }
 0x39b   :  { %v1015_v35 = vpop.f32.mrb[4].mxu0 }
 0x39c   :  { %v585_v36 = vadd.f32 %v1015_v35, %v491_v34  ;;  %v579_v37 = vpop.f32.mrb[5].mxu0  ;;  %v806_v34 = vld [vmem:[%s1371_s5] sm:$0x1]  ;;  %v811_v35 = vpop.permute.xlu1 %810 }
 0x39d   :  { %v580_v39 = vadd.f32 %v579_v37, %v487_v32 }
 0x39f   :  { %v1079_v41 = vpack.c.bf16 %v585_v36, %v580_v39  ;;  %v1018_v42 = vpop.f32.mrb[6].mxu0 }
 0x3a0   :  { %v595_v44 = vadd.f32 %v1018_v42, %v499_v40  ;;  %v589_v45 = vpop.f32.mrb[7].mxu0 }
 0x3a1   :  { %v590_v46 = vadd.f32 %v589_v45, %v495_v43  ;;  %1080 = vmatpush3.bf16.msra.mxu1 %v1079_v41 }
 0x3a2   :  { %1081 = vmatprep.subr.bf16.mxu1 %v1161_v17 }
 0x3a3   :  { %v1082_v47 = vpack.c.bf16 %v595_v44, %v590_v46 }
 0x3a5   :  { %1083 = vmatpush3.bf16.msra.mxu1 %v1082_v47 }
 0x3a6   :  { %1090 = vmatprep.subr.bf16.mxu1 %v1161_v17 }
 0x3a8   :  { %1028 = vmatmul.mubr.msk.f32.vlgmr.msra.gmra.mrb[4].mxu1 %vm269_vm6, %v1164_v33 }
 0x3a9   :  { %1049 = vmatprep.mubr.msk.f32.mxu1 %vm1162_vm5, %v1163_v18 }
 0x47b   :  { %v664_v18 = vpop.f32.mrb[4].mxu1 }
 0x47c   :  { %v668_v50 = vmul.f32 0.03125, %v664_v18  ;;  %v1029_v51 = vpop.f32.mrb[5].mxu1 }
 0x47e   :  { %v672_v52 = vrot.slane %v668_v50, %v1294_v38 }
 0x480   :  { %v673_v53 = vsub.f32 %v580_v39, %v672_v52  ;;  %v674_v54 = vsub.f32 %v585_v36, %v672_v52  ;;  %v675_v55 = vsub.f32 %v590_v46, %v672_v52  ;;  %v676_v9 = vsub.f32 %v595_v44, %v672_v52 }
 0x482   :  { %v677_v56 = vmul.f32 %v673_v53, %v673_v53  ;;  %v678_v57 = vmul.f32 %v674_v54, %v674_v54  ;;  %v679_v58 = vmul.f32 %v675_v55, %v675_v55  ;;  %v680_v10 = vmul.f32 %v676_v9, %v676_v9 }
 0x484   :  { %v1085_v12 = vpack.c.bf16 %v678_v57, %v677_v56  ;;  %v1088_v59 = vpack.c.bf16 %v680_v10, %v679_v58 }
 0x486   :  { %1086 = vmatpush3.bf16.msra.mxu0 %v1085_v12 }
 0x487   :  { %1087 = vmatprep.subr.bf16.mxu0 %v1161_v17 }
 0x48a   :  { %1089 = vmatpush3.bf16.msra.mxu0 %v1088_v59 }
 0x48d   :  { %1039 = vmatmul.mubr.msk.f32.vlgmr.msra.gmra.mrb[8].mxu0 %vm269_vm6, %v1164_v33 }
 0x560   :  { %v747_v62 = vpop.f32.mrb[8].mxu0 }
 0x561   :  { %v751_v63 = vmul.f32 0.03125, %v747_v62  ;;  %v1040_v0 = vpop.f32.mrb[9].mxu0 }
 0x563   :  { %v752_v1 = vadd.f32 1e-05, %v751_v63 }
 0x565   :  { %1133 = vrsqrt.f32 %v752_v1 }
 0x56f   :  { %v1134_v33 = vpop.eup %1133 }
 0x570   :  { %v757_v7 = vrot.slane %v1134_v33, %v1294_v38 }
 0x572   :  { %v758_v8 = vmul.f32 %v757_v7, %v673_v53  ;;  %v759_v11 = vmul.f32 %v757_v7, %v674_v54  ;;  %v761_v13 = vmul.f32 %v757_v7, %v676_v9  ;;  %v760_v15 = vmul.f32 %v757_v7, %v675_v55 }
 0x574   :  { %v778_v20 = vmul.f32 %v764_v61, %v758_v8  ;;  %v779_v21 = vmul.f32 %v768_v3, %v759_v11  ;;  %v781_v22 = vmul.f32 %v776_v5, %v761_v13  ;;  %v780_v23 = vmul.f32 %v772_v6, %v760_v15 }
 0x576   :  { %v798_v24 = vadd.f32 %v784_v2, %v778_v20  ;;  %v799_v25 = vadd.f32 %v788_v4, %v779_v21  ;;  %v801_v26 = vadd.f32 %v796_v16, %v781_v22  ;;  %v800_v27 = vadd.f32 %v792_v19, %v780_v23 }
 0x578   :  { %v802_v28 = vmax.f32 %v798_v24, 0.0  ;;  %v803_v29 = vmax.f32 %v799_v25, 0.0  ;;  %v805_v31 = vmax.f32 %v801_v26, 0.0  ;;  %v804_v32 = vmax.f32 %v800_v27, 0.0 }
 0x57a   :  { %v1091_v30 = vpack.c.bf16 %v803_v29, %v802_v28  ;;  %v1094_v38 = vpack.c.bf16 %v805_v31, %v804_v32 }
 0x57c   :  { %1092 = vmatpush3.bf16.msra.mxu1 %v1091_v30 }
 0x57d   :  { %1093 = vmatprep.subr.bf16.mxu1 %v1161_v17 }
 0x580   :  { %1095 = vmatpush3.bf16.msra.mxu1 %v1094_v38 }
 0x583   :  { %1050 = vmatmul.mubr.msk.f32.vlgmr.msra.gmra.mrb[6].mxu1 %vm269_vm6, %v806_v34 }
 0x656   :  { %v882_v36 = vpop.f32.mrb[6].mxu1 }
 0x657   :  { %v883_v37 = vadd.f32 %v882_v36, %v811_v35  ;;  %v1051_v39 = vpop.f32.mrb[7].mxu1 }
 0x659   :  { %887 = vst.msk [vmem:[#allocation2] sm:$0x1] %vm886_vm7, %v883_v37 }
 0x65a   :  { %1146 = shalt.err (!%p1143_p4)
}
 0x65b   :  { %s1147_s17 = scalar_lea.hbm %s1373_s7, 16 }
 0x65c   :  { %p1148_p5 = scmp.ne.s32.totalorder %s1373_s7, %s1147_s17  ;;  %p1151_p6 = scmp.lt.u32.totalorder %s1147_s17, %s1373_s7 }
 0x65e   :  { %p1153_p7 = pnand %p1151_p6, %p1148_p5 }
 0x660   :  { %1156 = shalt.err (!%p1153_p7)
}
 0x661   :  { %897 = dma.vmem_to_hbm [thread:$0]  %s895_s0, 16, %s1373_s7, [#allocation3]  }
 0x662   :  { %1157 = dma.done.wait [#allocation3], 16  }
 0x663   :  { %1158 = vsyncadd [#allocation3], 4294967280 }
 0x664   :  { %901 = vsyncpa [#allocation3], 1 }

</bundles_post_ra>
